<compile_context>
chip_gen: v7x
topology: tpu7x:2x2x1
jax: 0.10.0
libtpu: 0.0.40
codegen_flags: <defaults>
</compile_context>

<pallas_src>
import functools
import math

import jax
import jax.numpy as jnp
from jax.experimental import pallas as pl
from jax.experimental.pallas import tpu as pltpu

_BN_EPS = 1e-5           # nn.BatchNorm1d default eps
_L2_EPS_SQ = 1e-24       # F.normalize eps=1e-12, applied to the squared norm


def _bn_stats_kernel(x_ref, clusters_ref, sum_ref, sumsq_ref):
    """Pass 1: per-b-tile partial sum / sum-of-squares of x @ clusters.

    sum_ref / sumsq_ref are (1, 1, K) output blocks, one per batch tile, so the
    batch grid axis can run megacore-parallel; the wrapper sums the partials.
    """
    @pl.when(pl.program_id(1) == 0)
    def _init():
        sum_ref[...] = jnp.zeros_like(sum_ref)
        sumsq_ref[...] = jnp.zeros_like(sumsq_ref)

    tb, tn, d = x_ref.shape
    assign = jnp.dot(x_ref[...].reshape(tb * tn, d), clusters_ref[...],
                     preferred_element_type=jnp.float32)          # (tb*tn, K) f32
    sum_ref[...] += jnp.sum(assign, axis=0, keepdims=True)[None]
    sumsq_ref[...] += jnp.sum(assign * assign, axis=0, keepdims=True)[None]


def _netvlad_agg_kernel(x_ref, csc_ref, shift_ref, c2t_ref, out_ref, asum_acc,
                        *, mm_dtype, approx_softmax):
    """Pass 2: folded-BN softmax assignment, VLAD accumulation, normalization.

    Output layout is (TB, K, D): D on lanes -> lane-dense accumulate / stores.
    out_ref is resident across the N axis and doubles as the f32 accumulator.
    """
    n = pl.program_id(1)

    @pl.when(n == 0)
    def _init():
        out_ref[...] = jnp.zeros_like(out_ref)
        asum_acc[...] = jnp.zeros_like(asum_acc)

    tb, tn, d = x_ref.shape
    k = csc_ref.shape[1]

    x_mm = x_ref[...]                                             # (tb, tn, d) mm_dtype

    # Assignment logits; training-mode BatchNorm is pre-folded into
    # csc = clusters * scale and shift = beta - mean * scale -> one matmul+add.
    logits = jnp.dot(x_mm.reshape(tb * tn, d), csc_ref[...],
                     preferred_element_type=jnp.float32) + shift_ref[...]

    # Softmax over clusters: exp on the EUP; approx reciprocal instead of div.
    m = jnp.max(logits, axis=1, keepdims=True)
    e = jnp.exp(logits - m)
    denom = jnp.sum(e, axis=1, keepdims=True)
    if approx_softmax:
        p = e * pl.reciprocal(denom, approx=True)
    else:
        p = e / denom
    p3 = p.reshape(tb, tn, k)

    asum_acc[...] += jnp.sum(p3, axis=1, keepdims=True)           # (tb, 1, k)
    # Second contraction directly in (b, k, d) layout: D stays on lanes.
    out_ref[...] += jnp.einsum('bnk,bnd->bkd', p3.astype(mm_dtype), x_mm,
                               preferred_element_type=jnp.float32)

    @pl.when(n == pl.num_programs(1) - 1)
    def _finalize():
        # a[b, k, d] = a_sum[b, k] * clusters2[d, k], built in (k, d) layout as
        # diag(a_sum[b]) @ clusters2^T: a sublane broadcast + tiny f32 matmul,
        # avoiding any cross-lane transpose of the (1, K) a_sum vector.
        row = jax.lax.broadcasted_iota(jnp.int32, (k, k), 0)
        col = jax.lax.broadcasted_iota(jnp.int32, (k, k), 1)
        eye_k = (row == col).astype(jnp.float32)                  # (k, k)
        diag_asum = asum_acc[...] * eye_k[None, :, :]             # (tb, k, k)
        a = jnp.dot(diag_asum.reshape(tb * k, k), c2t_ref[...],
                    preferred_element_type=jnp.float32).reshape(tb, k, d)
        vlad = out_ref[...] - a
        # Intra-normalization: L2 over the feature dim D (torch F.normalize
        # dim=1 of the (B, D, K) tensor == the lane axis here).
        ssq1 = jnp.sum(vlad * vlad, axis=2, keepdims=True)        # (tb, k, 1)
        vlad = vlad * jax.lax.rsqrt(jnp.maximum(ssq1, _L2_EPS_SQ))
        # Global L2 normalization of the flattened (K*D) vector.
        ssq2 = jnp.sum(jnp.sum(vlad * vlad, axis=2, keepdims=True),
                       axis=1, keepdims=True)                     # (tb, 1, 1)
        vlad = vlad * jax.lax.rsqrt(jnp.maximum(ssq2, _L2_EPS_SQ))
        out_ref[...] = vlad.astype(out_ref.dtype)


def _pick_tile(n, target, align):
    """Largest multiple of `align` that divides `n` and is <= target (else n)."""
    if n <= target:
        return n
    t = (target // align) * align
    while t >= align:
        if n % t == 0:
            return t
        t -= align
    # TODO(synk): ragged-N remainder tiles via pl.BoundedSlice if ever needed.
    return n


def _vmem_limit_bytes(tb, tn, d, k, x_itemsize):
    """VMEM budget = actual tile working set + headroom, capped at 3/4 of the
    queried per-core VMEM (64 MiB/TC on v7x, 128 MiB on v5e/v6e)."""
    need = (2 * tb * tn * d * x_itemsize       # double-buffered x tile (dominant)
            + 2 * tb * k * d * 4               # resident out block (+ writeback)
            + tb * 8 * 128 * 4                 # padded a_sum scratch
            + 2 * d * k * (x_itemsize + 4)     # cluster matrices / BN vectors
            + (8 << 20))                       # compiler / internal headroom
    try:
        cap = int(pltpu.get_tpu_info().vmem_capacity_bytes)
    except Exception:
        cap = 64 << 20                         # conservative: v7x per-TC size
    return int(min(max(need, 32 << 20), cap * 3 // 4))


def netvlad_forward(x, clusters, clusters2, gamma, beta, *,
                    n_tile=2048, b_tile=1, mm_dtype=jnp.bfloat16,
                    approx_softmax=True):
    """x: (B, N, D) float -> (B, D*K) float32, matching the PyTorch forward
    (training-mode BatchNorm statistics)."""
    B, N, D = x.shape
    K = clusters.shape[-1]
    clusters = jnp.asarray(clusters, jnp.float32).reshape(D, K)
    clusters2 = jnp.asarray(clusters2, jnp.float32).reshape(D, K)
    gamma = jnp.asarray(gamma, jnp.float32).reshape(1, K)
    beta = jnp.asarray(beta, jnp.float32).reshape(1, K)

    # x is read by both passes: cast to the MXU operand dtype once here
    # (halves x HBM bytes when mm_dtype=bf16).
    x_mm = x if x.dtype == mm_dtype else x.astype(mm_dtype)

    TN = _pick_tile(N, n_tile, 8)                 # N tile (multiple of 8)
    TB = b_tile if (b_tile >= 1 and B % b_tile == 0) else B
    nb, nn = B // TB, N // TN
    mm_size = jnp.dtype(mm_dtype).itemsize
    x_bytes = x_mm.size * mm_size
    vmem_limit = _vmem_limit_bytes(TB, TN, D, K, mm_size)

    # ---- pass 1: per-b-tile partial (training-mode) BatchNorm statistics ---
    part_s, part_ss = pl.pallas_call(
        _bn_stats_kernel,
        out_shape=(jax.ShapeDtypeStruct((nb, 1, K), jnp.float32),
                   jax.ShapeDtypeStruct((nb, 1, K), jnp.float32)),
        grid=(nb, nn),
        in_specs=[pl.BlockSpec((TB, TN, D), lambda b, n: (b, n, 0)),
                  pl.BlockSpec((D, K), lambda b, n: (0, 0))],
        out_specs=(pl.BlockSpec((1, 1, K), lambda b, n: (b, 0, 0)),
                   pl.BlockSpec((1, 1, K), lambda b, n: (b, 0, 0))),
        compiler_params=pltpu.CompilerParams(
            # Per-b-tile stats blocks -> batch axis is parallel (v7x megacore);
            # N is the sequential reduction axis (last).
            dimension_semantics=("parallel", "arbitrary"),
            vmem_limit_bytes=vmem_limit),
        cost_estimate=pl.CostEstimate(
            flops=2 * B * N * D * K + 3 * B * N * K,
            transcendentals=0,
            bytes_accessed=x_bytes + D * K * mm_size + 2 * nb * K * 4),
    )(x_mm, clusters.astype(mm_dtype))

    # ---- fold the BatchNorm affine into the cluster matrix (tiny glue) -----
    # NOTE: variance = E[X^2] - E[X]^2 from per-b-tile f32 partials; for very
    # large B*N / large-magnitude logits this is less accurate than PyTorch's
    # BatchNorm reduction (documented, acceptable at the stated tolerances).
    s = jnp.sum(part_s, axis=0)                            # (1, K)
    ss = jnp.sum(part_ss, axis=0)                          # (1, K)
    count = jnp.float32(B * N)
    mean = s / count
    var = jnp.maximum(ss / count - mean * mean, 0.0)
    scale = gamma * jax.lax.rsqrt(var + _BN_EPS)           # (1, K)
    shift = beta - mean * scale                            # (1, K)
    clusters_scaled = (clusters * scale).astype(mm_dtype)  # (D, K)
    clusters2_t = clusters2.T                              # (K, D) f32

    # ---- pass 2: softmax assignment, VLAD accumulation, normalization ------
    out = pl.pallas_call(
        functools.partial(_netvlad_agg_kernel, mm_dtype=mm_dtype,
                          approx_softmax=approx_softmax),
        out_shape=jax.ShapeDtypeStruct((B, K, D), jnp.float32),
        grid_spec=pltpu.PrefetchScalarGridSpec(
            num_scalar_prefetch=0,
            grid=(nb, nn),
            in_specs=[
                pl.BlockSpec((TB, TN, D), lambda b, n: (b, n, 0)),
                pl.BlockSpec((D, K), lambda b, n: (0, 0)),
                pl.BlockSpec((1, K), lambda b, n: (0, 0)),
                pl.BlockSpec((K, D), lambda b, n: (0, 0)),
            ],
            out_specs=pl.BlockSpec((TB, K, D), lambda b, n: (b, 0, 0)),
            scratch_shapes=[pltpu.VMEM((TB, 1, K), jnp.float32)]),
        compiler_params=pltpu.CompilerParams(
            # Batch axis parallel (v7x megacore); N is the reduction axis.
            dimension_semantics=("parallel", "arbitrary"),
            vmem_limit_bytes=vmem_limit),
        cost_estimate=pl.CostEstimate(
            flops=4 * B * N * D * K + 8 * B * N * K,
            transcendentals=B * N * K,
            bytes_accessed=(x_bytes + D * K * (mm_size + 4) + 2 * K * 4
                            + B * K * D * 4)),
    )(x_mm, clusters_scaled, shift, clusters2_t)

    # (B, K, D) -> (B, D, K) -> flatten with index d*K + k, matching torch's
    # .view on the contiguous (B, D, K) tensor.  This one small XLA transpose
    # keeps the in-kernel accumulate / stores lane-dense over D and is cheap
    # next to the twice-read x stream.
    return jnp.transpose(out, (0, 2, 1)).reshape(B, D * K)


def netvlad_reference(x, clusters, clusters2, gamma, beta, eps=_BN_EPS):
    """Pure-JAX f32 reference mirroring the PyTorch forward (training-mode BN)."""
    B, N, D = x.shape
    K = clusters.shape[1]
    x2d = x.reshape(B * N, D)
    assign = x2d @ clusters
    mean = jnp.mean(assign, axis=0, keepdims=True)
    var = jnp.mean(jnp.square(assign - mean), axis=0, keepdims=True)
    assign = (assign - mean) / jnp.sqrt(var + eps) * gamma + beta
    assign = jax.nn.softmax(assign, axis=1)
    assign3 = assign.reshape(B, N, K)
    a_sum = jnp.sum(assign3, axis=1, keepdims=True)
    a = a_sum * clusters2[None, :, :]
    vlad = jnp.einsum('bnk,bnd->bkd', assign3, x)
    vlad = jnp.transpose(vlad, (0, 2, 1)) - a
    n1 = jnp.linalg.norm(vlad, axis=1, keepdims=True)
    vlad = vlad / jnp.maximum(n1, 1e-12)
    flat = vlad.reshape(B, D * K)
    n2 = jnp.linalg.norm(flat, axis=1, keepdims=True)
    return flat / jnp.maximum(n2, 1e-12)


if __name__ == "__main__":
    # Small shapes consistent with the module: B batches of N local descriptors
    # of dim D (feature_size), soft-assigned to K clusters (cluster_size).
    B, N, D, K = 2, 32, 64, 16

    key = jax.random.PRNGKey(0)
    k_x, k_c1, k_c2 = jax.random.split(key, 3)

    x = jax.random.normal(k_x, (B, N, D), dtype=jnp.float32)
    clusters = (1.0 / math.sqrt(D)) * jax.random.normal(k_c1, (D, K), dtype=jnp.float32)
    clusters2 = (1.0 / math.sqrt(D)) * jax.random.normal(k_c2, (1, D, K), dtype=jnp.float32)
    gamma = jnp.ones((K,), dtype=jnp.float32)    # BatchNorm1d weight init
    beta = jnp.zeros((K,), dtype=jnp.float32)    # BatchNorm1d bias init

    ref = netvlad_reference(x, clusters, clusters2.reshape(D, K),
                            gamma.reshape(1, K), beta.reshape(1, K))

    # n_tile=8 / b_tile=1 exercise both grid axes (2 batch tiles x 4 N tiles),
    # including the per-b-tile pass-1 partial-stat reduction.
    # f32 MXU operands: tight check of the two-pass pipeline itself.
    out_f32 = jax.block_until_ready(
        netvlad_forward(x, clusters, clusters2, gamma, beta,
                        n_tile=8, b_tile=1, mm_dtype=jnp.float32))
    assert out_f32.shape == (B, D * K)
    assert jnp.allclose(out_f32, ref, rtol=1e-2, atol=1e-2), "f32 mismatch vs reference"

    # bf16 x stream + bf16 MXU operands (v6e/v7x fast path), f32 accumulation.
    out_bf16 = jax.block_until_ready(
        netvlad_forward(x, clusters, clusters2, gamma, beta,
                        n_tile=8, b_tile=1, mm_dtype=jnp.bfloat16))
    assert out_bf16.shape == (B, D * K)
    assert jnp.allclose(out_bf16, ref, rtol=3e-2, atol=3e-2), "bf16 mismatch vs reference"

    # Default (large-tile) configuration: single N tile at these small shapes.
    out_def = jax.block_until_ready(
        netvlad_forward(x, clusters, clusters2, gamma, beta))
    assert jnp.allclose(out_def, ref, rtol=3e-2, atol=3e-2), "default-config mismatch"

    print("KERNEL_OK")
</pallas_src>

<mosaic_0001>
module attributes {stable_mosaic.version = 11 : i64} {
  func.func @_bn_stats_kernel(%arg0: i32, %arg1: i32, %arg2: memref<1x8x64xf32, #tpu.memory_space<vmem>>, %arg3: memref<64x16xf32, #tpu.memory_space<vmem>>, %arg4: memref<1x1x16xf32, #tpu.memory_space<vmem>>, %arg5: memref<1x1x16xf32, #tpu.memory_space<vmem>>) attributes {dimension_semantics = [#tpu.dimension_semantics<parallel>, #tpu.dimension_semantics<arbitrary>], iteration_bounds = array<i64: 2, 4>, scalar_prefetch = 0 : i64, scratch_operands = 0 : i64, tpu.core_type = #tpu.core_type<tc>, window_params = [{transform_indices = @transform_0, window_bounds = array<i64: 1, 8, 64>}, {pipeline_mode = #tpu.pipeline_mode<synchronous>, transform_indices = @transform_1, window_bounds = array<i64: 64, 16>}, {transform_indices = @transform_2, window_bounds = array<i64: 1, 1, 16>}, {transform_indices = @transform_3, window_bounds = array<i64: 1, 1, 16>}]} {
    %c0_i32 = arith.constant 0 : i32
    %0 = arith.cmpi eq, %arg1, %c0_i32 : i32
    %1 = arith.extui %0 : i1 to i32
    %c0_i32_0 = arith.constant 0 : i32
    %2 = arith.cmpi ne, %1, %c0_i32_0 : i32
    scf.if %2 {
      %cst_19 = arith.constant 0.000000e+00 : f32
      %20 = vector.broadcast %cst_19 : f32 to vector<1x1x16xf32>
      %c0_20 = arith.constant 0 : index
      %c0_21 = arith.constant 0 : index
      %c0_22 = arith.constant 0 : index
      %21 = vector.load %arg4[%c0_20, %c0_21, %c0_22] : memref<1x1x16xf32, #tpu.memory_space<vmem>>, vector<1x1x16xf32>
      tpu.vector_store %arg4[%c0_20, %c0_21, %c0_22], %20 {strides = array<i32>} : memref<1x1x16xf32, #tpu.memory_space<vmem>>, vector<1x1x16xf32>,
      %cst_23 = arith.constant 0.000000e+00 : f32
      %22 = vector.broadcast %cst_23 : f32 to vector<1x1x16xf32>
      %c0_24 = arith.constant 0 : index
      %c0_25 = arith.constant 0 : index
      %c0_26 = arith.constant 0 : index
      %23 = vector.load %arg5[%c0_24, %c0_25, %c0_26] : memref<1x1x16xf32, #tpu.memory_space<vmem>>, vector<1x1x16xf32>
      tpu.vector_store %arg5[%c0_24, %c0_25, %c0_26], %22 {strides = array<i32>} : memref<1x1x16xf32, #tpu.memory_space<vmem>>, vector<1x1x16xf32>,
    } else {
    }
    %c0 = arith.constant 0 : index
    %c0_1 = arith.constant 0 : index
    %c0_2 = arith.constant 0 : index
    %3 = vector.load %arg2[%c0, %c0_1, %c0_2] : memref<1x8x64xf32, #tpu.memory_space<vmem>>, vector<1x8x64xf32>
    %4 = vector.shape_cast %3 : vector<1x8x64xf32> to vector<8x64xf32>
    %c0_3 = arith.constant 0 : index
    %c0_4 = arith.constant 0 : index
    %5 = vector.load %arg3[%c0_3, %c0_4] : memref<64x16xf32, #tpu.memory_space<vmem>>, vector<64x16xf32>
    %cst = arith.constant dense<0.000000e+00> : vector<8x16xf32>
    %6 = tpu.matmul %4, %5, %cst {dimension_numbers = #tpu.dot_dimension_numbers<[1], [0], [0], [1], [0, 0, 1, 1], [], []>} : vector<8x64xf32>, vector<64x16xf32>, vector<8x16xf32> -> vector<8x16xf32>
    %c0_5 = arith.constant 0 : index
    %c0_6 = arith.constant 0 : index
    %c0_7 = arith.constant 0 : index
    %7 = vector.load %arg4[%c0_5, %c0_6, %c0_7] : memref<1x1x16xf32, #tpu.memory_space<vmem>>, vector<1x1x16xf32>
    %cst_8 = arith.constant dense<0.000000e+00> : vector<16xf32>
    %8 = vector.multi_reduction <add>, %6, %cst_8 [0] : vector<8x16xf32> to vector<16xf32>
    %9 = vector.shape_cast %8 : vector<16xf32> to vector<1x16xf32>
    %10 = vector.shape_cast %9 : vector<1x16xf32> to vector<1x1x16xf32>
    %11 = arith.addf %7, %10 : vector<1x1x16xf32>
    %c0_9 = arith.constant 0 : index
    %c0_10 = arith.constant 0 : index
    %c0_11 = arith.constant 0 : index
    %12 = vector.load %arg4[%c0_9, %c0_10, %c0_11] : memref<1x1x16xf32, #tpu.memory_space<vmem>>, vector<1x1x16xf32>
    tpu.vector_store %arg4[%c0_9, %c0_10, %c0_11], %11 {strides = array<i32>} : memref<1x1x16xf32, #tpu.memory_space<vmem>>, vector<1x1x16xf32>,
    %c0_12 = arith.constant 0 : index
    %c0_13 = arith.constant 0 : index
    %c0_14 = arith.constant 0 : index
    %13 = vector.load %arg5[%c0_12, %c0_13, %c0_14] : memref<1x1x16xf32, #tpu.memory_space<vmem>>, vector<1x1x16xf32>
    %14 = arith.mulf %6, %6 : vector<8x16xf32>
    %cst_15 = arith.constant dense<0.000000e+00> : vector<16xf32>
    %15 = vector.multi_reduction <add>, %14, %cst_15 [0] : vector<8x16xf32> to vector<16xf32>
    %16 = vector.shape_cast %15 : vector<16xf32> to vector<1x16xf32>
    %17 = vector.shape_cast %16 : vector<1x16xf32> to vector<1x1x16xf32>
    %18 = arith.addf %13, %17 : vector<1x1x16xf32>
    %c0_16 = arith.constant 0 : index
    %c0_17 = arith.constant 0 : index
    %c0_18 = arith.constant 0 : index
    %19 = vector.load %arg5[%c0_16, %c0_17, %c0_18] : memref<1x1x16xf32, #tpu.memory_space<vmem>>, vector<1x1x16xf32>
    tpu.vector_store %arg5[%c0_16, %c0_17, %c0_18], %18 {strides = array<i32>} : memref<1x1x16xf32, #tpu.memory_space<vmem>>, vector<1x1x16xf32>,
    return
  }
  func.func @transform_0(%arg0: i32, %arg1: i32) -> (i32, i32, i32) {
    %c0_i32 = arith.constant 0 : i32
    %c0_i32_0 = arith.constant 0 : i32
    return %arg0, %arg1, %c0_i32 : i32, i32, i32
  }
  func.func @transform_1(%arg0: i32, %arg1: i32) -> (i32, i32) {
    %c0_i32 = arith.constant 0 : i32
    %c0_i32_0 = arith.constant 0 : i32
    %c0_i32_1 = arith.constant 0 : i32
    return %c0_i32, %c0_i32_0 : i32, i32
  }
  func.func @transform_2(%arg0: i32, %arg1: i32) -> (i32, i32, i32) {
    %c0_i32 = arith.constant 0 : i32
    %c0_i32_0 = arith.constant 0 : i32
    %c0_i32_1 = arith.constant 0 : i32
    return %arg0, %c0_i32, %c0_i32_0 : i32, i32, i32
  }
  func.func @transform_3(%arg0: i32, %arg1: i32) -> (i32, i32, i32) {
    %c0_i32 = arith.constant 0 : i32
    %c0_i32_0 = arith.constant 0 : i32
    %c0_i32_1 = arith.constant 0 : i32
    return %arg0, %c0_i32, %c0_i32_0 : i32, i32, i32
  }
}

</mosaic_0001>

<bundles_post_ra>
// kernel: tpu_custom_call.1
= control target key start
LH: loop header
LB: loop body
LE: loop exit
PB: predicated region body
PF: predicated region fallthrough
CT: control target
= control target key end

     0   :  { %9 = vsyncpa [#allocation3], 0  ;;  %s941_s0 = inlined_call_operand.vmem [shape: f32[2,32,64], index: 0, kind: input, shape index: {}]   ;;  %s942_s1 = inlined_call_operand.vmem [shape: f32[64,16], index: 1, kind: input, shape index: {}]   ;;  %s943_s2 = inlined_call_operand.hbm [shape: f32[2,1,16], index: 2, kind: output, shape index: {0}]   ;;  %s944_s3 = inlined_call_operand.hbm [shape: f32[2,1,16], index: 3, kind: output, shape index: {1}]  }
   0x1   :  { %11 = vsyncpa [#allocation3 + $0x1], 0 }
   0x2   :  { %12 = vsyncpa [#allocation5], 0 }
   0x3   :  { %14 = vsyncpa [#allocation5 + $0x1], 0  ;;  %s731_s12 = smov 0   ;;  %s733_s13 = smov 0  }
   0x4   :  { %s735_s14 = smov 0   ;;  %s737_s15 = smov 0  }
   0x5   :  { %s739_s16 = smov 0   ;;  %s741_s17 = smov 0  }
   0x6   :  { %s743_s18 = smov 0   ;;  %s745_s19 = smov 0  }
   0x7 LB: > { %s444_s20 = sadd.s32 4294967295, %s703_s19   ;;  %s445_s21 = sadd.s32 4294967294, %s703_s19   ;;  %s703_s19 = sphi %s745_s19, %s20_s19   ;;  %s699_s18 = sphi %s743_s18, %s953_s18   ;;  %s695_s17 = sphi %s741_s17, %s952_s17   ;;  %s691_s16 = sphi %s739_s16, %s951_s16   ;;  %s687_s15 = sphi %s737_s15, %s950_s15   ;;  %s683_s14 = sphi %s735_s14, %s949_s14   ;;  %s679_s13 = sphi %s733_s13, %s948_s13   ;;  %s675_s12 = sphi %s731_s12, %s947_s12  }
   0x8   : > { %s29_s22 = sadd.s32 1, %s695_s17  ;;  %s32_s23 = sadd.s32 1, %s699_s18 }
   0x9   : > { %p30_p0 = scmp.ge.s32.totalorder %s29_s22, 4  ;;  %p98_p1 = scmp.ne.s32.totalorder %s683_s14, %s679_s13 }
   0xa   : > { %p99_p2 = scmp.eq.s32.totalorder %s444_s20, 7  ;;  %p104_p4 = scmp.ne.s32.totalorder %s679_s13, %s675_s12 }
   0xb   : > { %s955_s22 = smov (%p30_p0, %s29_s22), 0  ;;  %s957_s23 = smov (!%p30_p0, %s32_s23), %s699_s18 }
   0xc   : > { %p780_p3 = por %p99_p2, %p98_p1  ;;  %p34_p5 = scmp.ge.s32.totalorder %s957_s23, 2 }
   0xd   : > { %p105_p6 = scmp.eq.s32.totalorder %s445_s21, 7  ;;  %p448_p7 = scmp.ge.s32.totalorder %s703_s19, 1 }
   0xe   : > { %p163_p8 = scmp.lt.s32.totalorder %s703_s19, 9  ;;  %s959_s23 = smov (%p34_p5, %s957_s23), 0 }
   0xf   : > { %p790_p9 = por %p105_p6, %p104_p4  ;;  %s85_s26 = ssub.s32 %s699_s18, %s959_s23 }
  0x10   : > { %p164_p10 = pnand %p448_p7, %p163_p8  ;;  %s88_s27 = sadd.s32 1, %s683_s14 }
  0x11   : > { %p86_p11 = scmp.eq.s32.totalorder %s85_s26, 0  ;;  %s801_s29 = sand.u32 (!%p164_p10), 1, %s679_s13  }
  0x12   : > { %167 = sbr.rel (%p164_p10) target bundleno = 316 (0x13c), region = 28  ;;  %p193_p12 = scmp.lt.s32.totalorder (!%p164_p10), %s691_s16, 1 }
  0x13   : > { %s798_s28 = scalar_select %p86_p11, %s683_s14, %s88_s27  }
  0x14   : > { %p195_p13 = scmp.lt.s32.totalorder (!%p164_p10), %s687_s15, 3  ;;  %s813_s11 = scalar_lea.vmem (!%p164_p10), [#allocation2], %s801_s29 }
  0x15   : > { %s816_s20 = scalar_lea.vmem (!%p164_p10), [#allocation4], %s801_s29  ;;  %p451_p0 = scmp.ne.s32.totalorder (!%p164_p10), %s687_s15, 0 }
  0x19   : > { %s194_s30 = scalar_select %p193_p12, %s691_s16, 1 }
  0x1a   : > { %s196_s5 = scalar_select %p195_p13, %s687_s15, 3 }
  0x1b   : > { %s449_s4 = sshll.u32 %s194_s30, 2  ;;  %204 = sbr.rel (%p451_p0) target bundleno = 34 (0x22), region = 32  ;;  %vm205_vm0 = vcmask (!%p451_p0), 122880   ;;  %v705_v0 = vmov (!%p451_p0), 0.0  }
  0x1c   : > { %s198_s6 = sadd.s32 %s449_s4, %s196_s5  ;;  %206 = vst.msk [vmem:[%s813_s11] sm:$0x1] (!%p451_p0), %vm205_vm0, %v705_v0  ;;  %207 = vst.msk [vmem:[%s816_s20] sm:$0x1] (!%p451_p0), %vm205_vm0, %v705_v0 }
  0x1d   : > { %s450_s7 = sshll.u32 %s198_s6, 3 }
  0x1e   : > { %s810_s10 = scalar_lea.vmem %s941_s0, %s450_s7 }
  0x22 PF: > { %v209_v1 = vld [vmem:[%s942_s1] sm:$0xff]  ;;  %v210_v2 = vld [vmem:[%s942_s1 + $0x8] sm:$0xff]  ;;  %v211_v3 = vld [vmem:[%s942_s1 + $0x10] sm:$0xff]  ;;  %v706_v4 = vmov 0.0|0.0   ;;  %vm707_vm1 = vmmov 0   ;;  %v708_v7 = vmov 0.0  }
  0x23   : > { %485 = vmatprep.subr.bf16.mxu0 %v706_v4  ;;  %v486_v5 = vpack.c.bf16 %v210_v2, %v209_v1  ;;  %v212_v6 = vld [vmem:[%s942_s1 + $0x18] sm:$0xff]  ;;  %482 = vmatprep.mubr.msk.f32.mxu0 %vm707_vm1, %v708_v7  ;;  %v213_v9 = vld [vmem:[%s942_s1 + $0x20] sm:$0xff]  ;;  %v214_v10 = vld [vmem:[%s942_s1 + $0x28] sm:$0xff]  ;;  %vm217_vm2 = vcmask 523264   ;;  %vm292_vm3 = vcmask 130048   ;;  %s331_s5 = sshll.u32 %s813_s11, 4  ;;  %s856_s5 = int_to_ptr.vmem [resolvable:$true] %s331_s5 }
  0x24   : > { %v489_v8 = vpack.c.bf16 %v212_v6, %v211_v3  ;;  %v492_v11 = vpack.c.bf16 %v214_v10, %v213_v9  ;;  %v215_v12 = vld [vmem:[%s942_s1 + $0x30] sm:$0xff]  ;;  %v216_v13 = vld [vmem:[%s942_s1 + $0x38] sm:$0xff]  ;;  %v208_v15 = vld [vmem:[%s810_s10] sm:$0xff]  ;;  %s453_s10 = sshll.u32 %s691_s16, 4  ;;  %vm301_vm4 = vcmask 122880   ;;  %s344_s15 = sshll.u32 %s816_s20, 4  ;;  %s865_s15 = int_to_ptr.vmem [resolvable:$true] %s344_s15 }
  0x25   : > { %487 = vmatpush3.bf16.msra.mxu0 %v486_v5  ;;  %v495_v14 = vpack.c.bf16 %v216_v13, %v215_v12  ;;  %v291_v30 = vld [vmem:[%s813_s11] sm:$0x1]  ;;  %s854_s8 = scalar_lea.hbm %s943_s2, %s453_s10  ;;  %s863_s21 = scalar_lea.hbm %s944_s3, %s453_s10 }
  0x26   : > { %488 = vmatprep.subr.bf16.mxu0 %v706_v4  ;;  %v303_v33 = vld [vmem:[%s816_s20] sm:$0x1]  ;;  %s315_s26 = scalar_lea.sflag [#allocation3], %s801_s29  ;;  %s577_s27 = scalar_lea.vmem %s856_s5, 16 }
  0x27   : > { %p578_p1 = scmp.ne.s32.totalorder %s856_s5, %s577_s27  ;;  %s709_s30 = smov [#allocation2]  }
  0x28   : > { %s581_s4 = sshll.u32 %s709_s30, 4  ;;  %s582_s4 = int_to_ptr.vmem [resolvable:$false] %s581_s4 }
  0x29   : > { %490 = vmatpush3.bf16.msra.mxu0 %v489_v8  ;;  %p579_p2 = pnand %p578_p1, %p780_p3  ;;  %s583_s6 = scalar_lea.vmem %s582_s4, 32 }
  0x2a   : > { %491 = vmatprep.subr.bf16.mxu0 %v706_v4  ;;  %p584_p5 = scmp.lt.s32.totalorder %s856_s5, %s582_s4  ;;  %p585_p6 = scmp.lt.s32.totalorder %s583_s6, %s577_s27 }
  0x2b   : > { %p580_p4 = pneg %p579_p2 }
  0x2c   : > { %p586_p7 = por %p585_p6, %p584_p5 }
  0x2d   : > { %493 = vmatpush3.bf16.msra.mxu0 %v492_v11 }
  0x2e   : > { %494 = vmatprep.subr.bf16.mxu0 %v706_v4  ;;  %p587_p8 = pnand %p586_p7, %p580_p4 }
  0x31   : > { %496 = vmatpush3.bf16.msra.mxu0 %v495_v14 }
  0x34   : > { %483 = vmatmul.mubr.msk.f32.vlgmr.msra.gmra.mrb[0].mxu0 %vm217_vm2, %v208_v15 }
 0x107   : > { %v287_v16 = vpop.f32.mrb[0].mxu0 }
 0x108   : > { %v293_v17 = vsel %vm292_vm3, %v287_v16, 0.0  ;;  %v304_v18 = vmul.f32 %v287_v16, %v287_v16  ;;  %v484_v19 = vpop.f32.mrb[1].mxu0 }
 0x109   : > { %v294_v20 = vrot.slane %v293_v17, 4 }
 0x10a   : > { %v305_v21 = vsel %vm292_vm3, %v304_v18, 0.0 }
 0x10b   : > { %v295_v22 = vadd.f32 %v294_v20, %v293_v17  ;;  %v306_v23 = vrot.slane %v305_v21, 4 }
 0x10d   : > { %v296_v24 = vrot.slane %v295_v22, 2  ;;  %v307_v25 = vadd.f32 %v306_v23, %v305_v21 }
 0x10f   : > { %v297_v26 = vadd.f32 %v296_v24, %v295_v22  ;;  %v308_v27 = vrot.slane %v307_v25, 2 }
 0x111   : > { %v298_v28 = vrot.slane %v297_v26, 1  ;;  %v309_v29 = vadd.f32 %v308_v27, %v307_v25 }
 0x113   : > { %v299_v31 = vadd.f32 %v298_v28, %v297_v26  ;;  %v310_v32 = vrot.slane %v309_v29, 1 }
 0x115   : > { %v300_v34 = vadd.f32 %v299_v31, %v291_v30  ;;  %v311_v35 = vadd.f32 %v310_v32, %v309_v29 }
 0x117   : > { %302 = vst.msk [vmem:[%s813_s11] sm:$0x1] %vm301_vm4, %v300_v34  ;;  %v312_v36 = vadd.f32 %v311_v35, %v303_v33 }
 0x118   : > { %590 = shalt.err (!%p587_p8)
}
 0x119   : > { %s591_s11 = scalar_lea.hbm %s854_s8, 16  ;;  %s595_s16 = scalar_lea.hbm %s943_s2, 32 }
 0x11a   : > { %p592_p10 = scmp.ne.s32.totalorder %s854_s8, %s591_s11  ;;  %p596_p13 = scmp.lt.u32.totalorder %s854_s8, %s943_s2 }
 0x11b   : > { %p597_p0 = scmp.lt.u32.totalorder %s595_s16, %s591_s11  ;;  %p599_p2 = scmp.lt.u32.totalorder %s591_s11, %s854_s8 }
 0x11c   : > { %p593_p11 = pnand %p592_p10, %p780_p3 }
 0x11d   : > { %p598_p1 = por %p597_p0, %p596_p13 }
 0x11e   : > { %p594_p12 = pneg %p593_p11 }
 0x11f   : > { %p600_p4 = por %p599_p2, %p598_p1 }
 0x121   : > { %p601_p5 = pnand %p600_p4, %p594_p12 }
 0x123   : > { %604 = shalt.err (!%p601_p5)
}
 0x124   : > { %497 = dma.vmem_to_hbm [thread:$0]  (%p780_p3), %s856_s5, 16, %s854_s8, %s315_s26   ;;  %313 = vst.msk [vmem:[%s816_s20] sm:$0x1] %vm301_vm4, %v312_v36 }
 0x125   : > { %s319_s27 = scalar_lea.sflag [#allocation5], %s801_s29  ;;  %s605_s4 = scalar_lea.vmem %s865_s15, 16 }
 0x126   : > { %p606_p6 = scmp.ne.s32.totalorder %s865_s15, %s605_s4  ;;  %s710_s6 = smov [#allocation4]  }
 0x127   : > { %s609_s11 = sshll.u32 %s710_s6, 4  ;;  %s610_s11 = int_to_ptr.vmem [resolvable:$false] %s609_s11 }
 0x128   : > { %p607_p7 = pnand %p606_p6, %p780_p3  ;;  %s611_s10 = scalar_lea.vmem %s610_s11, 32 }
 0x129   : > { %p612_p10 = scmp.lt.s32.totalorder %s865_s15, %s610_s11  ;;  %p613_p11 = scmp.lt.s32.totalorder %s611_s10, %s605_s4 }
 0x12a   : > { %p608_p8 = pneg %p607_p7 }
 0x12b   : > { %p614_p12 = por %p613_p11, %p612_p10 }
 0x12d   : > { %p615_p13 = pnand %p614_p12, %p608_p8 }
 0x12f   : > { %618 = shalt.err (!%p615_p13)
}
 0x130   : > { %s619_s29 = scalar_lea.hbm %s863_s21, 16  ;;  %s623_s8 = scalar_lea.hbm %s944_s3, 32 }
 0x131   : > { %p620_p0 = scmp.ne.s32.totalorder %s863_s21, %s619_s29  ;;  %p624_p4 = scmp.lt.u32.totalorder %s863_s21, %s944_s3 }
 0x132   : > { %p625_p5 = scmp.lt.u32.totalorder %s623_s8, %s619_s29  ;;  %p627_p7 = scmp.lt.u32.totalorder %s619_s29, %s863_s21 }
 0x133   : > { %p621_p1 = pnand %p620_p0, %p780_p3 }
 0x134   : > { %p626_p6 = por %p625_p5, %p624_p4 }
 0x135   : > { %p622_p2 = pneg %p621_p1 }
 0x136   : > { %p628_p8 = por %p627_p7, %p626_p6 }
 0x138   : > { %p629_p10 = pnand %p628_p8, %p622_p2 }
 0x13a   : > { %632 = shalt.err (!%p629_p10)
}
 0x13b   : > { %498 = dma.vmem_to_hbm [thread:$0]  (%p780_p3), %s865_s15, 16, %s863_s21, %s319_s27  }
 0x13c PF: > { %p508_p11 = scmp.ge.s32.totalorder %s703_s19, 2  ;;  %s356_s16 = sand.u32 1, %s675_s12  }
 0x13d   : > { %s357_s9 = scalar_lea.sflag [#allocation3], %s356_s16 }
 0x13e   : > { %p502_p12 = pnand %p508_p11, %p790_p9 }
 0x140   : > { %666 = dma.done.wait (!%p502_p12), %s357_s9, 16  }
 0x141   : > { %668 = vsyncadd (!%p502_p12), %s357_s9, 4294967280  ;;  %s365_s30 = scalar_lea.sflag [#allocation5], %s356_s16 }
 0x142   : > { %670 = dma.done.wait (!%p502_p12), %s365_s30, 16  }
 0x143   : > { %672 = vsyncadd (!%p502_p12), %s365_s30, 4294967280  ;;  %s20_s19 = sadd.s32 1, %s703_s19   ;;  %s947_s12 = smov %s679_s13 }
 0x144   : > { %p17_p13 = scmp.ge.s32.totalorder %s20_s19, 10   ;;  %s948_s13 = smov %s683_s14 }
 0x145   : > { %s949_s14 = smov %s798_s28  ;;  %s950_s15 = smov %s695_s17 }
 0x146   : > { %s951_s16 = smov %s699_s18  ;;  %s952_s17 = smov %s955_s22 }
 0x147   : > { %s953_s18 = smov %s959_s23  ;;  %19 = sbr.rel (!%p17_p13) target bundleno = 7 (0x7), region = 84 }
 0x14e   :  { %369 = vsyncpa [#allocation3], 1 }
 0x14f   :  { %371 = vsyncpa [#allocation3 + $0x1], 1 }
 0x150   :  { %372 = vsyncpa [#allocation5], 1 }
 0x151   :  { %374 = vsyncpa [#allocation5 + $0x1], 1 }

</bundles_post_ra>
